<compile_context>
chip_gen: v7x
topology: tpu7x:2x2x1
jax: 0.10.0
libtpu: 0.0.40
codegen_flags: <defaults>
</compile_context>

<pallas_src>
import functools
import numpy as np

import jax
import jax.numpy as jnp
from jax import lax
from jax.experimental import pallas as pl
from jax.experimental.pallas import tpu as pltpu


_LN_EPS = 1e-5
_MASK_BIAS = -1e30           # additive mask bias (finite: no exp(-inf - -inf) NaN hazard)


def _vmem_capacity_bytes():
    try:
        cap = getattr(pltpu.get_tpu_info(), "vmem_capacity_bytes", None)
        if cap:
            return int(cap)
    except Exception:
        pass
    return 128 * 1024 * 1024


_VMEM_CAP = _vmem_capacity_bytes()
# ~96 MiB on v5e/v6e (128 MiB physical VMEM), ~48 MiB on v7x (64 MiB physical VMEM).
_VMEM_LIMIT = min(_VMEM_CAP * 3 // 4, 112 * 1024 * 1024)
# Bigger row tiles on 128-MiB parts amortize the per-grid-step overhead; 256 on v7x.
_ROW_TILE = 512 if _VMEM_CAP >= 100 * 1024 * 1024 else 256


def _row_block(rows):
    return rows if rows <= _ROW_TILE else _ROW_TILE


def _compiler_params(n_parallel_axes):
    return pltpu.CompilerParams(
        dimension_semantics=("parallel",) * n_parallel_axes,
        vmem_limit_bytes=_VMEM_LIMIT)


def _pick_head_block(n_head, d_head, qlen, klen):
    """Largest head block with 128-aligned lane width (or all heads) whose f32 score
    temporaries fit a slice of the VMEM budget (keeps v7x under its 64 MiB)."""
    budget = _VMEM_LIMIT // 4
    valid = [h for h in range(1, n_head + 1)
             if n_head % h == 0 and ((h * d_head) % 128 == 0 or h == n_head)]
    fitting = [h for h in valid if 6 * h * qlen * klen * 4 <= budget]
    return max(fitting) if fitting else min(valid)


# ----------------------------- Pallas kernels ------------------------------


def _proj_kernel(x_ref, w_ref, g_ref, b_ref, o_ref, *, eps, apply_ln):
    """Per row-tile: o = (LayerNorm?(x)) @ w.  LN in f32, matmul operands bf16, f32 acc."""
    x = x_ref[...]
    if apply_ln:
        mu = jnp.mean(x, axis=-1, keepdims=True)
        var = jnp.mean(jnp.square(x - mu), axis=-1, keepdims=True)
        x = (x - mu) * lax.rsqrt(var + eps) * g_ref[...] + b_ref[...]
    o_ref[...] = jnp.dot(x.astype(w_ref.dtype), w_ref[...],
                         preferred_element_type=jnp.float32).astype(o_ref.dtype)


def _out_kernel(av_ref, wo_ref, res_ref, g_ref, b_ref, o_ref, *, eps, apply_ln):
    """Per row-tile: o = maybe_LN(residual + attn_vec @ Wo).  Post-LN fused."""
    y = res_ref[...] + jnp.dot(av_ref[...], wo_ref[...],
                               preferred_element_type=jnp.float32)
    if apply_ln:
        mu = jnp.mean(y, axis=-1, keepdims=True)
        var = jnp.mean(jnp.square(y - mu), axis=-1, keepdims=True)
        y = (y - mu) * lax.rsqrt(var + eps) * g_ref[...] + b_ref[...]
    o_ref[...] = y.astype(o_ref.dtype)


def _rel_attn_kernel(q_ref, k_ref, v_ref, rk_ref, rwb_ref, rrb_ref, bias_ref, o_ref,
                     *, hb, d_head, qlen):
    """One (batch, head-block) step.

    q_ref   : (1, qlen, hb*d_head)  bf16, scale folded into the Q weight columns
    k_ref   : (1, klen, hb*d_head)  bf16   (K columns of the kv projection)
    v_ref   : (1, klen, hb*d_head)  bf16   (V columns of the kv projection)
    rk_ref  : (klen, hb*d_head)     bf16   projected relative position embeddings
    rwb_ref : (1, hb*d_head)        f32, r_w_bias * scale (pre-scaled on host)
    rrb_ref : (1, hb*d_head)        f32, r_r_bias * scale
    bias_ref: (qlen, klen)          f32 additive mask bias (0 / -1e30)
    o_ref   : (1, qlen, hb*d_head)  bf16 lane-dense attention output
    """
    klen = k_ref.shape[1]

    q = q_ref[0].reshape(qlen, hb, d_head)
    k = k_ref[0].reshape(klen, hb, d_head)
    v = v_ref[0].reshape(klen, hb, d_head)
    rk = rk_ref[...].reshape(klen, hb, d_head)
    rwb = rwb_ref[...].reshape(hb, d_head)
    rrb = rrb_ref[...].reshape(hb, d_head)

    q_rw = (q.astype(jnp.float32) + rwb[None, :, :]).astype(q.dtype)
    q_rr = (q.astype(jnp.float32) + rrb[None, :, :]).astype(q.dtype)

    # Batched per-head MXU dots; scores stay 3-D — no head-stacked VMEM copies.
    ac = jnp.einsum('qhd,khd->hqk', q_rw, k, preferred_element_type=jnp.float32)
    bd = jnp.einsum('qhd,khd->hqk', q_rr, rk, preferred_element_type=jnp.float32)

    # ---- relative shift (exact torch `_rel_shift` on every unmasked position) ----
    # Wanted:  bd_shift[h, i, j] = bd[h, i, j + qlen - 1 - i]  for j - i <= mlen.
    # Implemented as a per-row LEFT rotation by (qlen - 1 - i): a log2(qlen)-step barrel
    # shifter of constant XLU lane rotations (pltpu.roll) + broadcast row selects.
    # Rotation wrap only touches j - i > mlen positions, which the canonical mask kills.
    shift = (qlen - 1) - lax.broadcasted_iota(jnp.int32, (1, qlen, 1), 1)
    step = 1
    while step < qlen:                                  # unrolled at trace time
        rolled = pltpu.roll(bd, shift=klen - step, axis=2)   # left-rotate lanes by `step`
        bd = jnp.where((shift & step) != 0, rolled, bd)
        step *= 2

    # ---- masked softmax over klen ----
    score = ac + bd + bias_ref[...][None, :, :]
    m = jnp.max(score, axis=-1, keepdims=True)
    p = jnp.exp(score - m)
    denom = jnp.sum(p, axis=-1, keepdims=True)
    prob = (p * (1.0 / denom)).astype(v.dtype)          # one divide per row, bf16 for MXU

    # ---- AV, single lane-dense (qlen, hb*d_head) store ----
    av = jnp.einsum('hqk,khd->qhd', prob, v, preferred_element_type=jnp.float32)
    o_ref[0] = av.reshape(qlen, hb * d_head).astype(o_ref.dtype)


# ------------------------------ Pallas wrappers -----------------------------


def _pallas_proj(x, w, g2, b2, *, apply_ln, out_dtype=jnp.bfloat16):
    """(rows, K) @ (K, N) with optional fused LayerNorm on the input rows."""
    rows, k = x.shape
    n = w.shape[1]
    bm = _row_block(rows)
    return pl.pallas_call(
        functools.partial(_proj_kernel, eps=_LN_EPS, apply_ln=apply_ln),
        out_shape=jax.ShapeDtypeStruct((rows, n), out_dtype),
        grid=(pl.cdiv(rows, bm),),
        in_specs=[pl.BlockSpec((bm, k), lambda i: (i, 0)),
                  pl.BlockSpec((k, n), lambda i: (0, 0)),
                  pl.BlockSpec((1, k), lambda i: (0, 0)),
                  pl.BlockSpec((1, k), lambda i: (0, 0))],
        out_specs=pl.BlockSpec((bm, n), lambda i: (i, 0)),
        compiler_params=_compiler_params(1),
    )(x, w, g2, b2)


def _pallas_out_proj(av, wo, res, g2, b2, *, apply_ln):
    """(rows, F) @ (F, d_model) + residual, optionally with post-LayerNorm fused."""
    rows, f = av.shape
    d = wo.shape[1]
    bm = _row_block(rows)
    return pl.pallas_call(
        functools.partial(_out_kernel, eps=_LN_EPS, apply_ln=apply_ln),
        out_shape=jax.ShapeDtypeStruct((rows, d), jnp.float32),
        grid=(pl.cdiv(rows, bm),),
        in_specs=[pl.BlockSpec((bm, f), lambda i: (i, 0)),
                  pl.BlockSpec((f, d), lambda i: (0, 0)),
                  pl.BlockSpec((bm, d), lambda i: (i, 0)),
                  pl.BlockSpec((1, d), lambda i: (0, 0)),
                  pl.BlockSpec((1, d), lambda i: (0, 0))],
        out_specs=pl.BlockSpec((bm, d), lambda i: (i, 0)),
        compiler_params=_compiler_params(1),
    )(av, wo, res, g2, b2)


def _pallas_rel_attn(q_bm, kv_bm, rk, rwb_s, rrb_s, mask_bias, *, n_head, d_head, qlen):
    bsz, klen, _ = kv_bm.shape
    F = n_head * d_head
    hb = _pick_head_block(n_head, d_head, qlen, klen)
    n_hblk = n_head // hb
    hf = hb * d_head

    kernel = functools.partial(_rel_attn_kernel, hb=hb, d_head=d_head, qlen=qlen)
    return pl.pallas_call(
        kernel,
        out_shape=jax.ShapeDtypeStruct((bsz, qlen, F), jnp.bfloat16),
        grid=(bsz, n_hblk),
        in_specs=[
            pl.BlockSpec((1, qlen, hf), lambda b, h: (b, 0, h)),                 # q
            pl.BlockSpec((1, klen, hf), lambda b, h: (b, 0, h)),                 # k
            pl.BlockSpec((1, klen, hf), lambda b, h, o=n_hblk: (b, 0, o + h)),   # v
            pl.BlockSpec((klen, hf), lambda b, h: (0, h)),                       # rk
            pl.BlockSpec((1, hf), lambda b, h: (0, h)),                          # r_w_bias*scale
            pl.BlockSpec((1, hf), lambda b, h: (0, h)),                          # r_r_bias*scale
            pl.BlockSpec((qlen, klen), lambda b, h: (0, 0)),                     # mask bias
        ],
        out_specs=pl.BlockSpec((1, qlen, hf), lambda b, h: (b, 0, h)),
        compiler_params=_compiler_params(2),
    )(q_bm, kv_bm, kv_bm, rk, rwb_s, rrb_s, mask_bias)


# ------------------------------ forward (Pallas) ---------------------------


def rel_multihead_attn_pallas(w, r, params, attn_mask, mems=None, *,
                              n_head, d_head, pre_lnorm=False):
    qlen, bsz, d_model = w.shape
    rlen = r.shape[0]
    F = n_head * d_head
    scale = 1.0 / (d_head ** 0.5)

    cat = jnp.concatenate([mems, w], axis=0) if mems is not None else w
    klen = cat.shape[0]
    assert rlen == klen, "this kernel expects rlen == klen (see TODO)"
    assert klen >= qlen, "rel_shift kernel assumes klen >= qlen"

    g2 = params['ln_g'].reshape(1, d_model).astype(jnp.float32)
    b2 = params['ln_b'].reshape(1, d_model).astype(jnp.float32)

    # Host-side weight prep (one-time in a real model): split the qkv weight so Q is only
    # projected for live rows, fold the softmax scale into the Q columns and the relative
    # biases, cast matmul weights to bf16, and build the additive mask bias.
    qkv_w = params['qkv_w_t']
    q_w_t = (qkv_w[:, :F] * scale).astype(jnp.bfloat16)       # (d_model, F)
    kv_w_t = qkv_w[:, F:].astype(jnp.bfloat16)                # (d_model, 2F)
    r_w_t = params['r_w_t'].astype(jnp.bfloat16)              # (d_model, F)
    o_w_t = params['o_w_t'].astype(jnp.bfloat16)              # (F, d_model)
    rwb_s = (params['r_w_bias'] * scale).astype(jnp.float32).reshape(1, F)
    rrb_s = (params['r_r_bias'] * scale).astype(jnp.float32).reshape(1, F)
    mask_bias = attn_mask.astype(jnp.float32) * jnp.float32(_MASK_BIAS)   # (qlen, klen)

    # Single layout change to batch-major; all per-(batch, head-block) selection downstream
    # is done by BlockSpec index maps (no further HBM transposes before the final output).
    cat_bm = jnp.transpose(cat, (1, 0, 2))                    # (bsz, klen, d_model)
    w_bm = jnp.transpose(w, (1, 0, 2))                        # (bsz, qlen, d_model)
    cat_flat = cat_bm.reshape(bsz * klen, d_model)
    w_flat = w_bm.reshape(bsz * qlen, d_model)

    # Projections (row-tiled, pre-LN fused).  K/V over all klen rows, Q only over qlen rows.
    kv_flat = _pallas_proj(cat_flat, kv_w_t, g2, b2, apply_ln=pre_lnorm)     # (bsz*klen, 2F)
    q_flat = _pallas_proj(w_flat, q_w_t, g2, b2, apply_ln=pre_lnorm)         # (bsz*qlen, F)
    rk = _pallas_proj(r.astype(jnp.float32), r_w_t, g2, b2, apply_ln=False)  # (klen, F)

    q_bm = q_flat.reshape(bsz, qlen, F)
    kv_bm = kv_flat.reshape(bsz, klen, 2 * F)

    attn_bm = _pallas_rel_attn(q_bm, kv_bm, rk, rwb_s, rrb_s, mask_bias,
                               n_head=n_head, d_head=d_head, qlen=qlen)

    # o-projection + residual (+ post-LN); residual rows are w itself.
    av_flat = attn_bm.reshape(bsz * qlen, F)
    out_flat = _pallas_out_proj(av_flat, o_w_t, w_flat, g2, b2, apply_ln=not pre_lnorm)
    return jnp.transpose(out_flat.reshape(bsz, qlen, d_model), (1, 0, 2))


# ------------------------- pure-JAX reference (torch math) -----------------


def _rel_shift_ref(x):
    qlen, klen, bsz, nh = x.shape
    zero_pad = jnp.zeros((qlen, 1, bsz, nh), x.dtype)
    x_padded = jnp.concatenate([zero_pad, x], axis=1)
    x_padded = x_padded.reshape(klen + 1, qlen, bsz, nh)
    return x_padded[1:].reshape(qlen, klen, bsz, nh)


def forward_ref(w, r, params, attn_mask, mems, *, n_head, d_head, pre_lnorm):
    qlen, bsz, d_model = w.shape
    rlen = r.shape[0]
    scale = 1.0 / (d_head ** 0.5)

    def ln(x):
        mu = x.mean(-1, keepdims=True)
        var = ((x - mu) ** 2).mean(-1, keepdims=True)
        return (x - mu) / jnp.sqrt(var + _LN_EPS) * params['ln_g'] + params['ln_b']

    cat = jnp.concatenate([mems, w], axis=0) if mems is not None else w
    klen = cat.shape[0]
    inp = ln(cat) if pre_lnorm else cat

    w_heads = inp @ params['qkv_w_t']              # (klen, bsz, 3*nh*dh)
    r_head_k = r @ params['r_w_t']                 # (rlen, nh*dh)
    w_head_q, w_head_k, w_head_v = jnp.split(w_heads, 3, axis=-1)
    w_head_q = w_head_q[-qlen:]

    w_head_q = w_head_q.reshape(qlen, bsz, n_head, d_head)
    w_head_k = w_head_k.reshape(klen, bsz, n_head, d_head)
    w_head_v = w_head_v.reshape(klen, bsz, n_head, d_head)
    r_head_k = r_head_k.reshape(rlen, n_head, d_head)

    rw_head_q = w_head_q + params['r_w_bias']
    AC = jnp.einsum('ibnd,jbnd->ijbn', rw_head_q, w_head_k)
    rr_head_q = w_head_q + params['r_r_bias']
    BD = jnp.einsum('ibnd,jnd->ijbn', rr_head_q, r_head_k)
    BD = _rel_shift_ref(BD)

    attn_score = (AC + BD) * scale
    attn_score = jnp.where(attn_mask[:, :, None, None] > 0, -jnp.inf, attn_score)
    attn_prob = jax.nn.softmax(attn_score, axis=1)
    attn_vec = jnp.einsum('ijbn,jbnd->ibnd', attn_prob, w_head_v)
    attn_vec = attn_vec.reshape(qlen, bsz, n_head * d_head)
    attn_out = attn_vec @ params['o_w_t']
    return (w + attn_out) if pre_lnorm else ln(w + attn_out)


# ----------------------------------- main -----------------------------------


if __name__ == "__main__":
    n_head, d_model, d_head = 2, 32, 8
    qlen, mlen, bsz = 8, 4, 2
    klen = qlen + mlen

    key = jax.random.PRNGKey(0)
    ks = jax.random.split(key, 10)
    init = lambda k, shape: (0.02 * jax.random.normal(k, shape)).astype(jnp.float32)

    # Deterministic parameters (stored pre-transposed: y = x @ W^T of the torch Linear).
    params = {
        'qkv_w_t': init(ks[0], (d_model, 3 * n_head * d_head)),   # qkv_net.weight.T
        'r_w_t':   init(ks[1], (d_model, n_head * d_head)),       # r_net.weight.T
        'o_w_t':   init(ks[2], (n_head * d_head, d_model)),       # o_net.weight.T
        'r_w_bias': init(ks[3], (n_head, d_head)),
        'r_r_bias': init(ks[4], (n_head, d_head)),
        'ln_g': (1.0 + 0.1 * jax.random.normal(ks[5], (d_model,))).astype(jnp.float32),
        'ln_b': (0.1 * jax.random.normal(ks[6], (d_model,))).astype(jnp.float32),
    }

    w = jax.random.normal(ks[7], (qlen, bsz, d_model), jnp.float32)
    r = jax.random.normal(ks[8], (klen, d_model), jnp.float32)
    mems = jax.random.normal(ks[9], (mlen, bsz, d_model), jnp.float32)

    # Standard Transformer-XL decoder attention mask (1 = masked).
    attn_mask = jnp.triu(jnp.ones((qlen, klen), jnp.float32), k=1 + mlen)

    for pre_lnorm in (False, True):
        out = rel_multihead_attn_pallas(w, r, params, attn_mask, mems,
                                        n_head=n_head, d_head=d_head,
                                        pre_lnorm=pre_lnorm)
        out = jax.block_until_ready(out)
        ref = forward_ref(w, r, params, attn_mask, mems,
                          n_head=n_head, d_head=d_head, pre_lnorm=pre_lnorm)
        # bf16 MXU operands (f32 accumulation) vs. f32 reference -> looser tolerance.
        np.testing.assert_allclose(np.asarray(out), np.asarray(ref),
                                   rtol=2e-2, atol=2e-2)

    print("KERNEL_OK")
</pallas_src>

<mosaic_0001>
module attributes {stable_mosaic.version = 11 : i64} {
  func.func @_proj_kernel(%arg0: i32, %arg1: memref<24x32xf32, #tpu.memory_space<vmem>>, %arg2: memref<32x32xbf16, #tpu.memory_space<vmem>>, %arg3: memref<1x32xf32, #tpu.memory_space<vmem>>, %arg4: memref<1x32xf32, #tpu.memory_space<vmem>>, %arg5: memref<24x32xbf16, #tpu.memory_space<vmem>>) attributes {dimension_semantics = [#tpu.dimension_semantics<parallel>], iteration_bounds = array<i64: 1>, scalar_prefetch = 0 : i64, scratch_operands = 0 : i64, tpu.core_type = #tpu.core_type<tc>, window_params = [{transform_indices = @transform_0, window_bounds = array<i64: 24, 32>}, {pipeline_mode = #tpu.pipeline_mode<synchronous>, transform_indices = @transform_1, window_bounds = array<i64: 32, 32>}, {pipeline_mode = #tpu.pipeline_mode<synchronous>, transform_indices = @transform_2, window_bounds = array<i64: 1, 32>}, {pipeline_mode = #tpu.pipeline_mode<synchronous>, transform_indices = @transform_3, window_bounds = array<i64: 1, 32>}, {transform_indices = @transform_4, window_bounds = array<i64: 24, 32>}]} {
    %c0 = arith.constant 0 : index
    %c0_0 = arith.constant 0 : index
    %0 = vector.load %arg1[%c0, %c0_0] : memref<24x32xf32, #tpu.memory_space<vmem>>, vector<24x32xf32>
    %1 = arith.truncf %0 : vector<24x32xf32> to vector<24x32xbf16>
    %c0_1 = arith.constant 0 : index
    %c0_2 = arith.constant 0 : index
    %2 = vector.load %arg2[%c0_1, %c0_2] : memref<32x32xbf16, #tpu.memory_space<vmem>>, vector<32x32xbf16>
    %cst = arith.constant dense<0.000000e+00> : vector<24x32xf32>
    %3 = tpu.matmul %1, %2, %cst {dimension_numbers = #tpu.dot_dimension_numbers<[1], [0], [0], [1], [0, 0, 1, 1], [], []>} : vector<24x32xbf16>, vector<32x32xbf16>, vector<24x32xf32> -> vector<24x32xf32>
    %4 = arith.truncf %3 : vector<24x32xf32> to vector<24x32xbf16>
    %c0_3 = arith.constant 0 : index
    %c0_4 = arith.constant 0 : index
    %5 = vector.load %arg5[%c0_3, %c0_4] : memref<24x32xbf16, #tpu.memory_space<vmem>>, vector<24x32xbf16>
    tpu.vector_store %arg5[%c0_3, %c0_4], %4 {strides = array<i32>} : memref<24x32xbf16, #tpu.memory_space<vmem>>, vector<24x32xbf16>,
    return
  }
  func.func @transform_0(%arg0: i32) -> (i32, i32) {
    %c0_i32 = arith.constant 0 : i32
    %c0_i32_0 = arith.constant 0 : i32
    return %arg0, %c0_i32 : i32, i32
  }
  func.func @transform_1(%arg0: i32) -> (i32, i32) {
    %c0_i32 = arith.constant 0 : i32
    %c0_i32_0 = arith.constant 0 : i32
    %c0_i32_1 = arith.constant 0 : i32
    return %c0_i32, %c0_i32_0 : i32, i32
  }
  func.func @transform_2(%arg0: i32) -> (i32, i32) {
    %c0_i32 = arith.constant 0 : i32
    %c0_i32_0 = arith.constant 0 : i32
    %c0_i32_1 = arith.constant 0 : i32
    return %c0_i32, %c0_i32_0 : i32, i32
  }
  func.func @transform_3(%arg0: i32) -> (i32, i32) {
    %c0_i32 = arith.constant 0 : i32
    %c0_i32_0 = arith.constant 0 : i32
    %c0_i32_1 = arith.constant 0 : i32
    return %c0_i32, %c0_i32_0 : i32, i32
  }
  func.func @transform_4(%arg0: i32) -> (i32, i32) {
    %c0_i32 = arith.constant 0 : i32
    %c0_i32_0 = arith.constant 0 : i32
    return %arg0, %c0_i32 : i32, i32
  }
}

</mosaic_0001>

<bundles_post_ra>
// kernel: tpu_custom_call.1
= control target key start
LH: loop header
LB: loop body
LE: loop exit
PB: predicated region body
PF: predicated region fallthrough
CT: control target
= control target key end

     0   :  { %9 = vsyncpa [#allocation3], 0  ;;  %s433_s0 = inlined_call_operand.hbm [shape: f32[24,32], index: 0, kind: input, shape index: {}]   ;;  %s434_s1 = inlined_call_operand.hbm [shape: bf16[32,32], index: 1, kind: input, shape index: {}]   ;;  %s435_s2 = inlined_call_operand.hbm [shape: f32[1,32], index: 2, kind: input, shape index: {}]   ;;  %s436_s3 = inlined_call_operand.hbm [shape: f32[1,32], index: 3, kind: input, shape index: {}]   ;;  %s437_s4 = inlined_call_operand.hbm [shape: bf16[24,32], index: 4, kind: output, shape index: {}]  }
   0x1   :  { %10 = vsyncpa [#allocation6], 0 }
   0x2   :  { %11 = vsyncpa [#allocation9], 0 }
   0x3   :  { %12 = vsyncpa [#allocation4], 0  ;;  %s333_s15 = smov [#allocation5]   ;;  %s215_s19 = scalar_lea.hbm %s434_s1, 256 }
   0x4   :  { %s30_s16 = sshll.u32 %s333_s15, 4  ;;  %p216_p0 = scmp.ne.s32.totalorder %s434_s1, %s215_s19  ;;  %s31_s16 = int_to_ptr.vmem [resolvable:$true] %s30_s16 }
   0x5   :  { %p219_p1 = scmp.lt.u32.totalorder %s215_s19, %s434_s1 }
   0x7   :  { %p221_p2 = pnand %p219_p1, %p216_p0 }
   0x9   :  { %224 = shalt.err (!%p221_p2)
}
   0xa   :  { %s225_s24 = scalar_lea.vmem %s31_s16, 256  ;;  %p230_p4 = scmp.lt.s32.totalorder %s31_s16, %s31_s16 }
   0xb   :  { %p226_p3 = scmp.ne.s32.totalorder %s31_s16, %s225_s24  ;;  %p231_p5 = scmp.lt.s32.totalorder %s225_s24, %s225_s24 }
   0xd   :  { %p232_p6 = por %p231_p5, %p230_p4 }
   0xf   :  { %p233_p7 = pnand %p232_p6, %p226_p3 }
  0x11   :  { %236 = shalt.err (!%p233_p7)
}
  0x12   :  { %s334_s25 = smov 64   ;;  %s335_s26 = smov 4  }
  0x13   :  { %36 = dma.hbm_to_vmem [thread:$0]  %s434_s1, 256, %s31_s16, [#allocation6], %s334_s25, %s334_s25, %s335_s26  }
  0x14   :  { %s336_s29 = smov [#allocation2]   ;;  %s237_s7 = scalar_lea.hbm %s433_s0, 384 }
  0x15   :  { %s18_s30 = sshll.u32 %s336_s29, 4  ;;  %p238_p8 = scmp.ne.s32.totalorder %s433_s0, %s237_s7  ;;  %s19_s30 = int_to_ptr.vmem [resolvable:$true] %s18_s30 }
  0x16   :  { %p241_p9 = scmp.lt.u32.totalorder %s237_s7, %s433_s0 }
  0x18   :  { %p243_p10 = pnand %p241_p9, %p238_p8 }
  0x1a   :  { %246 = shalt.err (!%p243_p10)
}
  0x1b   :  { %s247_s12 = scalar_lea.vmem %s19_s30, 384  ;;  %p252_p12 = scmp.lt.s32.totalorder %s19_s30, %s19_s30 }
  0x1c   :  { %p248_p11 = scmp.ne.s32.totalorder %s19_s30, %s247_s12  ;;  %p253_p13 = scmp.lt.s32.totalorder %s247_s12, %s247_s12 }
  0x1e   :  { %p254_p0 = por %p253_p13, %p252_p12 }
  0x20   :  { %p255_p1 = pnand %p254_p0, %p248_p11 }
  0x22   :  { %258 = shalt.err (!%p255_p1)
}
  0x23   :  { %s337_s1 = smov 128   ;;  %s338_s13 = smov 8  }
  0x24   :  { %24 = dma.hbm_to_vmem [thread:$0]  %s433_s0, 384, %s19_s30, [#allocation3], %s337_s1, %s337_s1, %s338_s13  }
  0x25   :  { %s339_s16 = smov [#allocation7]   ;;  %s340_s18 = smov [#allocation8]  }
  0x26   :  { %s43_s17 = sshll.u32 %s339_s16, 4  ;;  %s53_s19 = sshll.u32 %s340_s18, 4  ;;  %s44_s17 = int_to_ptr.vmem [resolvable:$true] %s43_s17  ;;  %s54_s19 = int_to_ptr.vmem [resolvable:$true] %s53_s19 }
  0x27   :  { %s259_s22 = scalar_lea.hbm %s435_s2, 16 }
  0x28   :  { %p260_p2 = scmp.ne.s32.totalorder %s435_s2, %s259_s22  ;;  %p263_p3 = scmp.lt.u32.totalorder %s259_s22, %s435_s2 }
  0x2a   :  { %p265_p4 = pnand %p263_p3, %p260_p2 }
  0x2c   :  { %268 = shalt.err (!%p265_p4)
}
  0x2d   :  { %s269_s0 = scalar_lea.vmem %s44_s17, 16  ;;  %s273_s29 = scalar_lea.vmem %s44_s17, 32 }
  0x2e   :  { %p270_p5 = scmp.ne.s32.totalorder %s44_s17, %s269_s0  ;;  %p274_p6 = scmp.lt.s32.totalorder %s44_s17, %s44_s17 }
  0x2f   :  { %p275_p7 = scmp.lt.s32.totalorder %s273_s29, %s269_s0 }
  0x31   :  { %p276_p8 = por %p275_p7, %p274_p6 }
  0x33   :  { %p277_p9 = pnand %p276_p8, %p270_p5 }
  0x35   :  { %280 = shalt.err (!%p277_p9)
}
  0x36   :  { %46 = dma.hbm_to_vmem [thread:$0]  %s435_s2, 16, %s44_s17, [#allocation6]  }
  0x37   :  { %s281_s8 = scalar_lea.hbm %s436_s3, 16 }
  0x38   :  { %p282_p10 = scmp.ne.s32.totalorder %s436_s3, %s281_s8  ;;  %p285_p11 = scmp.lt.u32.totalorder %s281_s8, %s436_s3 }
  0x3a   :  { %p287_p12 = pnand %p285_p11, %p282_p10 }
  0x3c   :  { %290 = shalt.err (!%p287_p12)
}
  0x3d   :  { %s291_s1 = scalar_lea.vmem %s54_s19, 16  ;;  %s295_s13 = scalar_lea.vmem %s54_s19, 32 }
  0x3e   :  { %p292_p13 = scmp.ne.s32.totalorder %s54_s19, %s291_s1  ;;  %p296_p0 = scmp.lt.s32.totalorder %s54_s19, %s54_s19 }
  0x3f   :  { %p297_p1 = scmp.lt.s32.totalorder %s295_s13, %s291_s1 }
  0x41   :  { %p298_p2 = por %p297_p1, %p296_p0 }
  0x43   :  { %p299_p3 = pnand %p298_p2, %p292_p13 }
  0x45   :  { %302 = shalt.err (!%p299_p3)
}
  0x46   :  { %56 = dma.hbm_to_vmem [thread:$0]  %s436_s3, 16, %s54_s19, [#allocation9]  }
  0x47   :  { %325 = dma.done.wait [#allocation3], 384  }
  0x48   :  { %326 = vsyncadd [#allocation3], 4294966912 }
  0x49   :  { %327 = dma.done.wait [#allocation6], 272  }
  0x4a   :  { %328 = vsyncadd [#allocation6], 4294967024 }
  0x4b   :  { %329 = dma.done.wait [#allocation9], 16  }
  0x4c   :  { %330 = vsyncadd [#allocation9], 4294967280  ;;  %v213_v0 = vld [vmem:[#allocation5] sm:$0xff]   ;;  %v214_v1 = vld [vmem:[#allocation5 + $0x8] sm:$0xff]   ;;  %vm91_vm0 = vcmask 261120   ;;  %vm159_vm1 = vcmask 257024  }
  0x4d   :  { %196 = vmatprep.subr.bf16.mxu0 %v213_v0  ;;  %v70_v2 = vld [vmem:[#allocation2] sm:$0xff]  ;;  %v71_v3 = vld [vmem:[#allocation2 + $0x8] sm:$0xff]  ;;  %v72_v5 = vld [vmem:[#allocation2 + $0x10] sm:$0xff]  ;;  %s341_s3 = smov [#allocation10]  }
  0x4e   :  { %197 = vmatpush3.bf16.msra.mxu0 %v213_v0  ;;  %v73_v4 = vpack.c.bf16 %v71_v3, %v70_v2  ;;  %v74_v6 = vpack.c.bf16 %v72_v5, %v72_v5  ;;  %s168_s15 = sshll.u32 %s341_s3, 4  ;;  %s169_s15 = int_to_ptr.vmem [resolvable:$true] %s168_s15 }
  0x4f   :  { %198 = vmatprep.subr.bf16.mxu0 %v214_v1  ;;  %s303_s16 = scalar_lea.vmem %s169_s15, 192  ;;  %p308_p5 = scmp.lt.s32.totalorder %s169_s15, %s169_s15 }
  0x50   :  { %200 = vmatprep.mubr.msk.bf16.mxu0 %vm91_vm0, %v73_v4  ;;  %p304_p4 = scmp.ne.s32.totalorder %s169_s15, %s303_s16  ;;  %p309_p6 = scmp.lt.s32.totalorder %s303_s16, %s303_s16 }
  0x52   :  { %199 = vmatpush3.bf16.msra.mxu0 %v214_v1  ;;  %p310_p7 = por %p309_p6, %p308_p5 }
  0x54   :  { %p311_p8 = pnand %p310_p7, %p304_p4 }
  0x55   :  { %201 = vmatmul.mubr.msk.bf16.vlgmr.msra.gmra.mrb[0].mxu0 %vm91_vm0, %v74_v6 }
 0x128   :  { %v202_v7 = vpop.f32.mrb[0].mxu0 }
 0x129   :  { %v191_v8 = vpack.c.bf16 %v202_v7, %v202_v7  ;;  %v132_v9 = vpop.f32.mrb[1].mxu0 }
 0x12a   :  { %v189_v10 = vpack.c.bf16 %v132_v9, %v132_v9  ;;  %v203_v11 = vpop.f32.mrb[2].mxu0 }
 0x12b   :  { %162 = vst.msk [vmem:[#allocation10 + $0x8] sm:$0xf] %vm159_vm1, %v191_v8  ;;  %v135_v12 = vpop.f32.mrb[3].mxu0 }
 0x12c   :  { %160 = vst.msk [vmem:[#allocation10] sm:$0xf] %vm159_vm1, %v189_v10  ;;  %v190_v13 = vpack.c.bf16 %v135_v12, %v135_v12 }
 0x12e   :  { %161 = vst.msk [vmem:[#allocation10 + $0x4] sm:$0xf] %vm159_vm1, %v190_v13 }
 0x12f   :  { %314 = shalt.err (!%p311_p8)
}
 0x130   :  { %s315_s19 = scalar_lea.hbm %s437_s4, 192 }
 0x131   :  { %p316_p9 = scmp.ne.s32.totalorder %s437_s4, %s315_s19  ;;  %p319_p10 = scmp.lt.u32.totalorder %s315_s19, %s437_s4 }
 0x133   :  { %p321_p11 = pnand %p319_p10, %p316_p9 }
 0x135   :  { %324 = shalt.err (!%p321_p11)
}
 0x136   :  { %174 = dma.vmem_to_hbm [thread:$0]  %s169_s15, 192, %s437_s4, [#allocation4], %s334_s25, %s334_s25, %s335_s26  }
 0x137   :  { %331 = dma.done.wait [#allocation4], 192  }
 0x138   :  { %332 = vsyncadd [#allocation4], 4294967104 }
 0x139   :  { %178 = vsyncpa [#allocation3], 1 }
 0x13a   :  { %179 = vsyncpa [#allocation6], 1 }
 0x13b   :  { %180 = vsyncpa [#allocation9], 1 }
 0x13c   :  { %181 = vsyncpa [#allocation4], 1 }

</bundles_post_ra>
